<compile_context>
chip_gen: v5e
topology: v5e:2x2
jax: 0.10.0
libtpu: 0.0.40
codegen_flags: <defaults>
</compile_context>

<pallas_src>
import functools

import jax
import jax.numpy as jnp
from jax.experimental import pallas as pl
from jax.experimental.pallas import tpu as pltpu


def _layernorm_rows_kernel(x_ref, alpha_ref, bias_ref, o_ref, *, eps):
    """LayerNorm over the last axis of a (ROWS, D) tile.

    Matches torch LayerNormalization: f32 compute, mean + unbiased std
    (ddof=1), eps added to std, scalar alpha/bias affine.
    """
    x = x_ref[...].astype(jnp.float32)                        # (ROWS, D)
    d = x.shape[-1]

    # Two-pass moments: mean first, then sum of squared deviations (numerically
    # safe when |mean| >> std; the extra VPU pass is hidden under HBM stalls).
    mean = jnp.sum(x, axis=-1, keepdims=True) * jnp.float32(1.0 / d)   # (ROWS,1)
    diff = x - mean
    var = jnp.sum(diff * diff, axis=-1, keepdims=True) * jnp.float32(
        1.0 / (d - 1))                                                  # ddof=1
    std = jnp.sqrt(var)

    # Per-row reciprocal on the EUP slot (exact: free in this mem-bound regime);
    # fold scalar alpha into the row scale (one fewer full-tile VPU mul).
    inv = pl.reciprocal(std + jnp.float32(eps), approx=False)  # (ROWS, 1)
    scale = alpha_ref[0] * inv
    o_ref[...] = (diff * scale + bias_ref[0]).astype(o_ref.dtype)


def decoder_forward(x, encoder_out, src_mask, tgt_mask, alpha, bias, eps=1e-6):
    """Pallas implementation of Decoder.forward.

    The decoder sub-layers are an opaque nn.ModuleList in the PyTorch source
    (no definition given), so the layer loop is the identity here; the defined
    compute (final LayerNormalization) runs inside the Pallas kernel.
    """
    # TODO(synk): decoder sub-layers (self-attn / cross-attn / FFN blocks) are
    # supplied externally to the PyTorch module and are not defined in the
    # given source; the per-layer loop is therefore a no-op here.
    del encoder_out, src_mask, tgt_mask

    orig_shape = x.shape
    D = orig_shape[-1]
    # D == 1 would make the unbiased (d-1) divisor zero, same as torch.std.
    x2 = x.reshape(-1, D)
    n_rows = x2.shape[0]

    # Row-tile sizing: multiple of 8 sublanes, ~3 MiB of f32 per input tile so
    # double-buffered input + output (~4x tile ~= 12 MiB) stays under the
    # 16 MiB scoped-VMEM default on v5e (and well under v6e/v7x).
    bytes_per_row = D * 4
    target_rows = max(8, (3 * 1024 * 1024) // max(1, bytes_per_row))
    target_rows = max(8, (target_rows // 8) * 8)

    rows_ceil8 = ((n_rows + 7) // 8) * 8
    if rows_ceil8 > 8:
        # v7x megacore: cap the block at half the row extent so the "parallel"
        # grid axis always has >= 2 blocks to shard across both TensorCores.
        half8 = max(8, (((rows_ceil8 + 1) // 2 + 7) // 8) * 8)
        block_rows = min(target_rows, half8)
    else:
        block_rows = min(target_rows, rows_ceil8)

    # No wrapper-side padding: Pallas handles the trailing partial block
    # (junk reads are isolated per-row; out-of-range writes are dropped).
    grid = (pl.cdiv(n_rows, block_rows),)
    kernel = functools.partial(_layernorm_rows_kernel, eps=eps)

    # Mem-bound elementwise + per-row reduce: 1 read + 1 write per element.
    cost = pl.CostEstimate(
        flops=int(7 * n_rows * D),
        transcendentals=int(2 * n_rows),  # sqrt + reciprocal per row
        bytes_accessed=int(x2.dtype.itemsize * n_rows * D + 4 * n_rows * D),
    )

    # NOTE: block last dim equals the full array dim D, so the (8,128)
    # constraint is satisfied (stores are lane-dense/unmasked when D is a
    # multiple of 128, e.g. D=128 here).  Output dtype is float32, matching the
    # PyTorch module's explicit cast to float32 before the affine.
    out2 = pl.pallas_call(
        kernel,
        out_shape=jax.ShapeDtypeStruct((n_rows, D), jnp.float32),
        grid_spec=pl.GridSpec(
            grid=grid,
            in_specs=[
                pl.BlockSpec((block_rows, D), lambda i: (i, 0)),
                pl.BlockSpec(memory_space=pltpu.MemorySpace.SMEM),  # alpha (1,)
                pl.BlockSpec(memory_space=pltpu.MemorySpace.SMEM),  # bias  (1,)
            ],
            out_specs=pl.BlockSpec((block_rows, D), lambda i: (i, 0)),
        ),
        compiler_params=pltpu.CompilerParams(
            dimension_semantics=("parallel",),
        ),
        cost_estimate=cost,
    )(x2, alpha, bias)

    return out2.reshape(orig_shape)


def _reference(x, alpha, bias, eps=1e-6):
    x = x.astype(jnp.float32)
    mean = jnp.mean(x, axis=-1, keepdims=True)
    std = jnp.std(x, axis=-1, keepdims=True, ddof=1)
    return alpha[0] * (x - mean) / (std + eps) + bias[0]


if __name__ == "__main__":
    key = jax.random.PRNGKey(0)
    k1, k2 = jax.random.split(key)

    B, S, D = 2, 8, 128          # batch, target seq len, model dim
    S_SRC = 8                    # source seq len (for encoder_out / masks)

    x = jax.random.normal(k1, (B, S, D), dtype=jnp.float32)
    encoder_out = jax.random.normal(k2, (B, S_SRC, D), dtype=jnp.float32)
    src_mask = jnp.ones((B, 1, S, S_SRC), dtype=jnp.float32)
    tgt_mask = jnp.tril(jnp.ones((S, S), dtype=jnp.float32))[None, None]

    # LayerNormalization parameters: alpha = ones(1), bias = zeros(1)
    alpha = jnp.ones((1,), dtype=jnp.float32)
    bias = jnp.zeros((1,), dtype=jnp.float32)

    out = decoder_forward(x, encoder_out, src_mask, tgt_mask, alpha, bias)
    out = jax.block_until_ready(out)

    ref = _reference(x, alpha, bias)
    assert out.shape == (B, S, D) and out.dtype == jnp.float32
    # Exact reciprocal now -> tight tolerance.
    assert jnp.max(jnp.abs(out - ref)) < 2e-5

    print("KERNEL_OK")
</pallas_src>

<mosaic_0001>
module attributes {stable_mosaic.version = 11 : i64} {
  func.func @_layernorm_rows_kernel(%arg0: i32, %arg1: memref<8x128xf32, #tpu.memory_space<vmem>>, %arg2: memref<1xf32, #tpu.memory_space<smem>>, %arg3: memref<1xf32, #tpu.memory_space<smem>>, %arg4: memref<8x128xf32, #tpu.memory_space<vmem>>) attributes {dimension_semantics = [#tpu.dimension_semantics<parallel>], iteration_bounds = array<i64: 2>, scalar_prefetch = 0 : i64, scratch_operands = 0 : i64, tpu.core_type = #tpu.core_type<tc>, window_params = [{transform_indices = @transform_0, window_bounds = array<i64: 8, 128>}, {transform_indices = @transform_1, window_bounds = array<i64: 1>}, {transform_indices = @transform_2, window_bounds = array<i64: 1>}, {transform_indices = @transform_3, window_bounds = array<i64: 8, 128>}]} {
    %c0 = arith.constant 0 : index
    %c0_0 = arith.constant 0 : index
    %0 = vector.load %arg1[%c0, %c0_0] : memref<8x128xf32, #tpu.memory_space<vmem>>, vector<8x128xf32>
    %cst = arith.constant dense<0.000000e+00> : vector<8xf32>
    %1 = vector.multi_reduction <add>, %0, %cst [1] : vector<8x128xf32> to vector<8xf32>
    %2 = vector.shape_cast %1 : vector<8xf32> to vector<8x1xf32>
    %cst_1 = arith.constant 7.812500e-03 : f32
    %3 = vector.broadcast %cst_1 : f32 to vector<8x1xf32>
    %4 = arith.mulf %2, %3 : vector<8x1xf32>
    %5 = vector.broadcast %4 : vector<8x1xf32> to vector<8x128xf32>
    %6 = arith.subf %0, %5 : vector<8x128xf32>
    %7 = arith.mulf %6, %6 : vector<8x128xf32>
    %cst_2 = arith.constant dense<0.000000e+00> : vector<8xf32>
    %8 = vector.multi_reduction <add>, %7, %cst_2 [1] : vector<8x128xf32> to vector<8xf32>
    %9 = vector.shape_cast %8 : vector<8xf32> to vector<8x1xf32>
    %cst_3 = arith.constant 0.00787401571 : f32
    %10 = vector.broadcast %cst_3 : f32 to vector<8x1xf32>
    %11 = arith.mulf %9, %10 : vector<8x1xf32>
    %12 = math.sqrt %11 : vector<8x1xf32>
    %cst_4 = arith.constant 9.99999997E-7 : f32
    %13 = vector.broadcast %cst_4 : f32 to vector<8x1xf32>
    %14 = arith.addf %12, %13 : vector<8x1xf32>
    %15 = tpu.reciprocal %14 : vector<8x1xf32> -> vector<8x1xf32>
    %c0_5 = arith.constant 0 : index
    %16 = memref.load %arg2[%c0_5] : memref<1xf32, #tpu.memory_space<smem>>
    %17 = vector.broadcast %16 : f32 to vector<8x1xf32>
    %18 = arith.mulf %17, %15 : vector<8x1xf32>
    %19 = vector.broadcast %18 : vector<8x1xf32> to vector<8x128xf32>
    %20 = arith.mulf %6, %19 : vector<8x128xf32>
    %c0_6 = arith.constant 0 : index
    %21 = memref.load %arg3[%c0_6] : memref<1xf32, #tpu.memory_space<smem>>
    %22 = vector.broadcast %21 : f32 to vector<8x128xf32>
    %23 = arith.addf %20, %22 : vector<8x128xf32>
    %c0_7 = arith.constant 0 : index
    %c0_8 = arith.constant 0 : index
    %24 = vector.load %arg4[%c0_7, %c0_8] : memref<8x128xf32, #tpu.memory_space<vmem>>, vector<8x128xf32>
    tpu.vector_store %arg4[%c0_7, %c0_8], %23 {strides = array<i32>} : memref<8x128xf32, #tpu.memory_space<vmem>>, vector<8x128xf32>,
    return
  }
  func.func @transform_0(%arg0: i32) -> (i32, i32) {
    %c0_i32 = arith.constant 0 : i32
    %c0_i32_0 = arith.constant 0 : i32
    return %arg0, %c0_i32 : i32, i32
  }
  func.func @transform_1(%arg0: i32) -> i32 {
    %c0_i32 = arith.constant 0 : i32
    %c0_i32_0 = arith.constant 0 : i32
    return %c0_i32 : i32
  }
  func.func @transform_2(%arg0: i32) -> i32 {
    %c0_i32 = arith.constant 0 : i32
    %c0_i32_0 = arith.constant 0 : i32
    return %c0_i32 : i32
  }
  func.func @transform_3(%arg0: i32) -> (i32, i32) {
    %c0_i32 = arith.constant 0 : i32
    %c0_i32_0 = arith.constant 0 : i32
    return %arg0, %c0_i32 : i32, i32
  }
}

</mosaic_0001>

<bundles_post_ra>
// kernel: tpu_custom_call.1
= control target key start
LH: loop header
LB: loop body
LE: loop exit
PB: predicated region body
PF: predicated region fallthrough
CT: control target
= control target key end

     0   :  { %s637_s0 = inlined_call_operand.hbm [shape: f32[16,128], index: 0, kind: input, shape index: {}]   ;;  %s638_s1 = inlined_call_operand.<no memory space> [shape: f32[1], index: 1, kind: input, shape index: {}]   ;;  %s639_s2 = inlined_call_operand.<no memory space> [shape: f32[1], index: 2, kind: input, shape index: {}]   ;;  %s640_s3 = inlined_call_operand.hbm [shape: f32[16,128], index: 3, kind: output, shape index: {}]  }
   0x1   :  { %8 = sst [smem:[#allocation2]] %s638_s1 }
   0x2   :  { %9 = sst [smem:[#allocation3]] %s639_s2 }
   0x3   :  { %10 = vsyncpa [#allocation5], 0 }
   0x4   :  { %12 = vsyncpa [#allocation5 + $0x1], 0 }
   0x5   :  { %13 = vsyncpa [#allocation6], 0 }
   0x6   :  { %15 = vsyncpa [#allocation6 + $0x1], 0  ;;  %s506_s16 = smov 0   ;;  %s508_s17 = smov 0  }
   0x7   :  { %s510_s18 = smov 0   ;;  %s512_s19 = smov 0  }
   0x8 LB: > { %s527_s1 = sadd.s32 4294967295, %s478_s19   ;;  %s320_s2 = sadd.s32 4294967294, %s478_s19   ;;  %s478_s19 = sphi %s512_s19, %s650_s19   ;;  %s474_s18 = sphi %s510_s18, %s649_s18   ;;  %s470_s17 = sphi %s508_s17, %s648_s17   ;;  %s466_s16 = sphi %s506_s16, %s647_s16  }
   0x9   : > { %s531_s20 = sadd.s32 1, %s478_s19   ;;  %s28_s21 = sadd.s32 1, %s474_s18 }
   0xa   : > { %s25_s22 = ssub.s32 %s478_s19, %s531_s20  ;;  %p35_p0 = scmp.ne.s32.totalorder %s474_s18, %s470_s17 }
   0xb   : > { %p26_p1 = scmp.eq.s32.totalorder %s25_s22, 0  ;;  %p36_p2 = scmp.eq.s32.totalorder %s478_s19, 0 }
   0xc   : > { %p41_p3 = scmp.ne.s32.totalorder %s470_s17, %s466_s16  ;;  %p42_p4 = scmp.eq.s32.totalorder %s527_s1, 0 }
   0xd   : > { %s543_s23 = scalar_select %p26_p1, %s474_s18, %s28_s21  }
   0xe   : > { %p545_p5 = por %p36_p2, %p35_p0  ;;  %p549_p6 = por %p42_p4, %p41_p3 }
   0xf   : > { %p107_p7 = scmp.eq.s32.totalorder %s527_s1, 1  ;;  %p113_p8 = scmp.eq.s32.totalorder %s320_s2, 1 }
  0x10   : > { %p344_p10 = scmp.lt.s32.totalorder %s478_s19, 2  ;;  %s139_s28 = sand.u32 1, %s474_s18  }
  0x11   : > { %p556_p11 = por %p107_p7, %p35_p0  ;;  %p560_p12 = por %p113_p8, %p41_p3 }
  0x12   : > { %s324_s29 = sshll.u32 %s478_s19, 3  ;;  %s323_s30 = sshll.u32 %s139_s28, 3 }
  0x13   : > { %s147_s6 = scalar_lea.hbm %s637_s0, %s324_s29  ;;  %s143_s8 = scalar_lea.vmem [#allocation4], %s323_s30 }
  0x14   : > { %s149_s7 = sshll.u32 %s147_s6, 4  ;;  %s151_s9 = sshll.u32 %s143_s8, 4  ;;  %s150_s7 = int_to_ptr.hbm [resolvable:$true] %s149_s7  ;;  %s152_s9 = int_to_ptr.vmem [resolvable:$true] %s151_s9 }
  0x15   : > { %p571_p13 = pnand %p344_p10, %p545_p5  ;;  %p325_p0 = scmp.ge.s32.totalorder %s478_s19, 1 }
  0x16   : > { %p156_p1 = scmp.lt.s32.totalorder %s478_s19, 3  ;;  %s140_s11 = scalar_lea.sflag [#allocation5], %s139_s28 }
  0x17   : > { %s382_s12 = sshra.s32 %s150_s7, 4  ;;  %p386_p3 = pneg %p571_p13  ;;  %s383_s12 = int_to_ptr.hbm [resolvable:$true] %s382_s12 }
  0x18   : > { %s384_s13 = scalar_lea.hbm %s383_s12, 8  ;;  %s389_s2 = scalar_lea.hbm %s637_s0, 16 }
  0x19   : > { %p385_p2 = scmp.ne.s32.totalorder %s383_s12, %s384_s13  ;;  %p390_p5 = scmp.lt.s32.totalorder %s383_s12, %s637_s0 }
  0x1a   : > { %p391_p8 = scmp.lt.s32.totalorder %s389_s2, %s384_s13 }
  0x1b   : > { %p387_p4 = pnand %p386_p3, %p385_p2 }
  0x1c   : > { %p392_p10 = por %p391_p8, %p390_p5 }
  0x1d   : > { %p388_p7 = pneg %p387_p4 }
  0x1f   : > { %p393_p9 = pnand %p392_p10, %p388_p7 }
  0x21   : > { %396 = shalt.err (!%p393_p9)
}
  0x22   : > { %339 = dma.hbm_to_vmem [thread:$0]  (!%p571_p13), %s150_s7, 128, %s152_s9, %s140_s11  }
  0x23   : > { %p157_p2 = pnand %p325_p0, %p156_p1 }
  0x24   : > { %s592_s24 = sand.u32 (!%p157_p2), 1, %s470_s17  }
  0x25   : > { %160 = sbr.rel (%p157_p2) target bundleno = 333 (0x14d), region = 32  ;;  %s326_s28 = sshll.u32 (!%p157_p2), %s592_s24, 3 }
  0x26   : > { %s163_s29 = scalar_lea.sflag (!%p157_p2), [#allocation5], %s592_s24  ;;  %s166_s30 = scalar_lea.vmem (!%p157_p2), [#allocation4], %s326_s28 }
  0x2a   : > { %457 = dma.done.wait (%p549_p6), %s163_s29, 128  }
  0x2b   : > { %459 = vsyncadd (%p549_p6), %s163_s29, 4294967168  ;;  %v190_v0 = vld [vmem:[%s166_s30] sm:$0xff]  ;;  %s226_s25 = sld [smem:[#allocation2]]  ;;  %s329_s5 = sshll.u32 %s527_s1, 3 }
  0x2c   : > { %191 = vadd.xlane.f32.xlu0 %v190_v0  ;;  %s230_s4 = sld [smem:[#allocation3]]  ;;  %s245_s8 = scalar_lea.hbm %s640_s3, %s329_s5 }
  0x2d   : > { %s189_s9 = scalar_lea.vmem [#allocation7], %s326_s28  ;;  %s249_s1 = sshll.u32 %s245_s8, 4  ;;  %s250_s1 = int_to_ptr.hbm [resolvable:$true] %s249_s1 }
  0x2e   : > { %s247_s10 = sshll.u32 %s189_s9, 4  ;;  %s235_s11 = scalar_lea.sflag [#allocation6], %s592_s24  ;;  %s248_s10 = int_to_ptr.vmem [resolvable:$true] %s247_s10 }
  0x2f   : > { %s426_s12 = sshra.s32 %s250_s1, 4  ;;  %s432_s2 = scalar_lea.hbm %s640_s3, 16  ;;  %s427_s12 = int_to_ptr.hbm [resolvable:$true] %s426_s12 }
  0x30   : > { %s428_s13 = scalar_lea.hbm %s427_s12, 8  ;;  %p433_p0 = scmp.lt.s32.totalorder %s427_s12, %s640_s3 }
  0x31   : > { %v227_v25 = vstv %s226_s25  ;;  %p429_p6 = scmp.ne.s32.totalorder %s427_s12, %s428_s13  ;;  %p434_p1 = scmp.lt.s32.totalorder %s432_s2, %s428_s13 }
  0x32   : > { %v231_v30 = vstv %s230_s4 }
  0x33   : > { %p430_p9 = pnand %p429_p6, %p556_p11  ;;  %p435_p3 = por %p434_p1, %p433_p0 }
  0x35   : > { %p431_p13 = pneg %p430_p9 }
  0x37   : > { %p436_p4 = pnand %p435_p3, %p431_p13 }
  0x9f   : > { %v192_v1 = vpop.xlane.xlu0 %191 }
  0xa0   : > { %v193_v2 = vmul.f32 0.0078125, %v192_v1 }
  0xa2   : > { %v194_v3 = vsub.f32 %v190_v0, %v193_v2 }
  0xa4   : > { %v195_v4 = vmul.f32 %v194_v3, %v194_v3 }
  0xa6   : > { %196 = vadd.xlane.f32.xlu0 %v195_v4 }
 0x119   : > { %v197_v5 = vpop.xlane.xlu0 %196 }
 0x11a   : > { %v198_v6 = vmul.f32 0.007874016, %v197_v5 }
 0x11c   : > { %378 = vrsqrt.f32 %v198_v6  ;;  %vm206_vm0 = vcmp.eq.f32.partialorder %v198_v6, inf  ;;  %v209_v14 = vand.u32 2147483648, %v198_v6  ;;  %vm208_vm1 = vcmp.eq.f32.partialorder %v198_v6, 0.0 }
 0x122   : > { %v379_v7 = vpop.eup %378 }
 0x123   : > { %v200_v8 = vmul.f32 %v379_v7, %v198_v6 }
 0x125   : > { %v201_v9 = vmul.f32 %v379_v7, %v200_v8 }
 0x127   : > { %v202_v10 = vmul.f32 0.5, %v201_v9 }
 0x129   : > { %v203_v11 = vsub.f32 1.5, %v202_v10 }
 0x12b   : > { %v204_v12 = vmul.f32 %v379_v7, %v203_v11 }
 0x12d   : > { %v205_v13 = vmul.f32 %v204_v12, %v198_v6 }
 0x12f   : > { %v207_v15 = vsel %vm206_vm0, %v198_v6, %v205_v13 }
 0x130   : > { %v210_v16 = vsel %vm208_vm1, %v209_v14, %v207_v15 }
 0x131   : > { %v211_v17 = vadd.f32 1e-06, %v210_v16 }
 0x133   : > { %380 = vrcp.f32 %v211_v17  ;;  %v223_v21 = vand.u32 2147483648, %v211_v17  ;;  %v221_v23 = vand.u32 2147483647, %v211_v17  ;;  %vm217_vm3 = vweird.f32 %v211_v17 }
 0x135   : > { %v224_v26 = vor.u32 1.1754944e-38, %v223_v21  ;;  %vm222_vm5 = vcmp.eq.f32.partialorder %v221_v23, 8.507059e+37 }
 0x139   : > { %v381_v18 = vpop.eup %380 }
 0x13a   : > { %v213_v19 = vmul.f32 %v381_v18, %v211_v17  ;;  %vm218_vm2 = vweird.f32 %v381_v18 }
 0x13b   : > { %vm219_vm4 = vmor %vm217_vm3, %vm218_vm2 }
 0x13c   : > { %v214_v20 = vsub.f32 1.0, %v213_v19 }
 0x13e   : > { %v215_v22 = vmul.f32 %v381_v18, %v214_v20 }
 0x140   : > { %v216_v24 = vadd.f32 %v381_v18, %v215_v22 }
 0x142   : > { %v220_v27 = vsel %vm219_vm4, %v381_v18, %v216_v24 }
 0x143   : > { %v225_v28 = vsel %vm222_vm5, %v224_v26, %v220_v27 }
 0x144   : > { %v228_v29 = vmul.f32 %v227_v25, %v225_v28 }
 0x146   : > { %v229_v31 = vmul.f32 %v228_v29, %v194_v3 }
 0x148   : > { %v232_v32 = vadd.f32 %v231_v30, %v229_v31 }
 0x14a   : > { %233 = vst [vmem:[%s189_s9] sm:$0xff] %v232_v32 }
 0x14b   : > { %439 = shalt.err (!%p436_p4)
}
 0x14c   : > { %334 = dma.vmem_to_hbm [thread:$0]  (%p556_p11), %s248_s10, 128, %s250_s1, %s235_s11  }
 0x14d PF: > { %s261_s24 = sand.u32 1, %s466_s16   ;;  %p646_p7 = scmp.ge.s32.totalorder %s478_s19, 2 }
 0x14e   : > { %s262_s28 = scalar_lea.sflag [#allocation6], %s261_s24 }
 0x14f   : > { %p341_p5 = pnand %p646_p7, %p560_p12 }
 0x151   : > { %p342_p8 = pneg %p341_p5 }
 0x153   : > { %461 = dma.done.wait (%p342_p8), %s262_s28, 128  }
 0x154   : > { %463 = vsyncadd (%p342_p8), %s262_s28, 4294967168  ;;  %p18_p10 = scmp.ge.s32.totalorder %s531_s20, 4   ;;  %s647_s16 = smov %s470_s17 }
 0x155   : > { %s648_s17 = smov %s474_s18  ;;  %s649_s18 = smov %s543_s23 }
 0x156   : > { %s650_s19 = smov %s531_s20  ;;  %20 = sbr.rel (!%p18_p10) target bundleno = 8 (0x8), region = 77 }
 0x15b   :  { %268 = vsyncpa [#allocation5], 1 }
 0x15c   :  { %270 = vsyncpa [#allocation5 + $0x1], 1 }
 0x15d   :  { %271 = vsyncpa [#allocation6], 1 }
 0x15e   :  { %273 = vsyncpa [#allocation6 + $0x1], 1 }

</bundles_post_ra>
